<compile_context>
chip_gen: v7x
topology: tpu7x:2x2x1
jax: 0.10.0
libtpu: 0.0.40
codegen_flags: <defaults>
</compile_context>

<pallas_src>
import functools

import jax
import jax.numpy as jnp
from jax.experimental import pallas as pl
from jax.experimental.pallas import tpu as pltpu


# ---------------------------------------------------------------------------
# Exact-form GELU (erf) via the Abramowitz & Stegun 7.1.26 polynomial
# (|err| <= 1.5e-7). Only mul/add/select/exp (+ one reciprocal) — guaranteed
# Mosaic lowering, matches torch.nn.GELU() well below test tolerance.
# ---------------------------------------------------------------------------
_ERF_P = 0.3275911
_ERF_A1 = 0.254829592
_ERF_A2 = -0.284496736
_ERF_A3 = 1.421413741
_ERF_A4 = -1.453152027
_ERF_A5 = 1.061405429
_INV_SQRT2 = 0.7071067811865476


def _erf_approx(x, approx_recip):
    ax = jnp.abs(x)
    denom = 1.0 + _ERF_P * ax
    if approx_recip:
        t = pl.reciprocal(denom, approx=True)   # EUP slot -> nearly free
    else:
        t = 1.0 / denom                          # exact path (tight f32 check)
    poly = t * (_ERF_A1 + t * (_ERF_A2 + t * (_ERF_A3 + t * (_ERF_A4 + t * _ERF_A5))))
    y = 1.0 - poly * jnp.exp(-ax * ax)
    return jnp.where(x >= 0, y, -y)


def _gelu_erf(x, approx_recip=False):
    return 0.5 * x * (1.0 + _erf_approx(x * _INV_SQRT2, approx_recip))


# ---------------------------------------------------------------------------
# Kernels
# ---------------------------------------------------------------------------
def _ffn_kernel_resident(x_ref, w1_ref, b1_ref, w2_ref, b2_ref, o_ref, *, approx_recip):
    """Whole weights resident in VMEM. Block shapes:
       x:(bm,E)  w1:(E,H)  b1:(1,H)  w2:(H,E)  b2:(1,E)  o:(bm,E)"""
    x = x_ref[...].astype(w1_ref.dtype)                     # in-kernel cast (free VPU)
    h = jnp.dot(x, w1_ref[...], preferred_element_type=jnp.float32)
    h = _gelu_erf(h + b1_ref[...], approx_recip)            # bias + GELU in f32
    # Dropout(p=0.0) == identity.
    o = jnp.dot(h.astype(w2_ref.dtype), w2_ref[...], preferred_element_type=jnp.float32)
    o_ref[...] = (o + b2_ref[...]).astype(o_ref.dtype)


def _ffn_kernel_htiled(x_ref, w1_ref, b1_ref, w2_ref, b2_ref, o_ref, acc_ref, *,
                       approx_recip):
    """Hidden-dim tiled path (grid = (M//bm, H//th), H last / 'arbitrary').
       x:(bm,E)  w1:(E,th)  b1:(1,th)  w2:(th,E)  b2:(1,E)  o:(bm,E)  acc:(bm,E) f32"""
    h_idx = pl.program_id(1)

    @pl.when(h_idx == 0)
    def _():
        acc_ref[...] = jnp.zeros_like(acc_ref)

    x = x_ref[...].astype(w1_ref.dtype)
    hh = jnp.dot(x, w1_ref[...], preferred_element_type=jnp.float32)
    hh = _gelu_erf(hh + b1_ref[...], approx_recip)
    acc_ref[...] += jnp.dot(hh.astype(w2_ref.dtype), w2_ref[...],
                            preferred_element_type=jnp.float32)

    @pl.when(h_idx == pl.num_programs(1) - 1)
    def _():
        o_ref[...] = (acc_ref[...] + b2_ref[...]).astype(o_ref.dtype)


# ---------------------------------------------------------------------------
# Hardware / spec helpers
# ---------------------------------------------------------------------------
def _round_up(x, m):
    return (x + m - 1) // m * m


def _vmem_limit_bytes():
    cap = 64 * 1024 * 1024        # conservative fallback: v7x per-TC VMEM
    try:
        info = pltpu.get_tpu_info()
        c = getattr(info, "vmem_capacity_bytes", None)
        if c:
            cap = int(c)
    except Exception:
        pass
    # Leave headroom; cap at ~100 MiB on 128 MiB chips (v5e/v6e), ~54 MiB on v7x.
    return min(int(cap * 0.85), 100 * 1024 * 1024)


def _num_tensorcores():
    try:
        kind = jax.devices()[0].device_kind.lower()
        if ("v7" in kind) or ("v4" in kind) or ("v5p" in kind):
            return 2
    except Exception:
        pass
    return 1   # v5e / v6e: single TensorCore -> grid is a serial loop


def _probe_single_buffering():
    try:
        pl.BlockSpec((8, 128), lambda i: (0, 0), pipeline_mode=pl.Buffered(1))
        return True
    except Exception:
        return False


_HAS_BUFFERED = _probe_single_buffering()


def _const_spec(shape, index_map, single_buffer):
    """BlockSpec for operands whose index_map never changes: single-buffer when
    supported (double-buffering them is pure VMEM waste)."""
    if single_buffer:
        return pl.BlockSpec(shape, index_map, pipeline_mode=pl.Buffered(1))
    return pl.BlockSpec(shape, index_map)


# ---------------------------------------------------------------------------
# VMEM budgeting / tiling selection
# ---------------------------------------------------------------------------
def _resident_vmem_bytes(bm, E, H, wsize, xsize, osize, weight_bufs):
    weights = weight_bufs * ((E * H + H * E) * wsize + (H + E) * 4)
    acts = 2 * bm * E * xsize + 2 * bm * E * osize          # double-buffered in/out
    interm = bm * H * 4 + bm * E * 4                        # f32 intermediates
    return weights + acts + interm


def _htiled_vmem_bytes(bm, E, H, th, wsize, xsize, osize):
    wtiles = 2 * (E * th * wsize + th * 4 + th * E * wsize) + E * 4
    acts = 2 * bm * E * xsize + 2 * bm * E * osize
    acc = bm * E * 4
    interm = bm * th * 4
    return wtiles + acts + acc + interm


def _pick_block_h(H):
    for c in (2048, 1024, 512, 256, 128):
        if H % c == 0:
            return c
    # TODO(synk): for H not divisible by any lane-aligned tile, zero-pad W1^T/b1/W2^T
    # along H once in prepare_params instead of falling back to th = H.
    return H


def _select_tiling(M, E, H, wsize, xsize, osize, weight_bufs, budget, n_tc,
                   block_m=None, block_h=None, force_h_tiling=False):
    """Returns (bm, th). th is None for the resident-weight single-axis path."""
    max_bm = max(8, _round_up(min(M, 512), 8))
    candidates = [c for c in (512, 256, 128, 64, 32, 16, 8) if c <= max_bm]
    if not candidates:
        candidates = [max_bm]
    if block_m is not None:
        candidates = [max(8, _round_up(block_m, 8))]

    def _tc_adjust(bm):
        # Keep >= 2 grid steps only when there are >= 2 TensorCores to shard across.
        if n_tc >= 2 and pl.cdiv(M, bm) < 2 and M > 8:
            return max(8, _round_up(pl.cdiv(M, 2), 8))
        return bm

    if not force_h_tiling:
        for bm in candidates:
            if _resident_vmem_bytes(bm, E, H, wsize, xsize, osize, weight_bufs) <= budget:
                return _tc_adjust(bm), None

    th = block_h if block_h is not None else _pick_block_h(H)
    if H % th != 0:
        th = H
    for bm in candidates:
        if _htiled_vmem_bytes(bm, E, H, th, wsize, xsize, osize) <= budget:
            return _tc_adjust(bm), th
    return 8, th   # last resort


# ---------------------------------------------------------------------------
# Parameter prep + wrapper
# ---------------------------------------------------------------------------
def prepare_params(params, compute_dtype=jnp.float32, approx_recip=None):
    """One-time prep (outside the hot path): transpose PyTorch (out,in) weights to
    (in,out), optionally cast MXU operands (bf16 recommended on v5e/v6e/v7x — MXU takes
    bf16 at full rate, halves weight DMA + residency). Biases stay f32; accumulation,
    bias-add and GELU are always f32."""
    if approx_recip is None:
        approx_recip = jnp.dtype(compute_dtype) == jnp.dtype(jnp.bfloat16)
    return {
        "w1t": jnp.asarray(params["w1"].T, dtype=compute_dtype),   # (E, H)
        "b1": params["b1"].reshape(1, -1).astype(jnp.float32),     # (1, H)
        "w2t": jnp.asarray(params["w2"].T, dtype=compute_dtype),   # (H, E)
        "b2": params["b2"].reshape(1, -1).astype(jnp.float32),     # (1, E)
        "approx_recip": bool(approx_recip),
    }


def feed_forward(x, prepared, *, block_m=None, block_h=None, force_h_tiling=False,
                 out_dtype=None):
    """Pallas forward matching FeedForward.forward(x). x: (..., E)."""
    orig_shape = x.shape
    E = orig_shape[-1]
    w1t, b1 = prepared["w1t"], prepared["b1"]
    w2t, b2 = prepared["w2t"], prepared["b2"]
    H = w1t.shape[1]
    approx_recip = prepared["approx_recip"]
    out_dtype = x.dtype if out_dtype is None else out_dtype

    # Flatten leading dims into rows. No pad / slice / cast passes over HBM:
    # Pallas masks the ragged final block; cast to compute dtype happens in-kernel.
    x2 = x.reshape(-1, E)
    M = x2.shape[0]

    wsize = jnp.dtype(w1t.dtype).itemsize
    xsize = jnp.dtype(x2.dtype).itemsize
    osize = jnp.dtype(out_dtype).itemsize

    vmem_limit = _vmem_limit_bytes()
    budget = int(vmem_limit * 0.9)
    n_tc = _num_tensorcores()
    weight_bufs = 1 if _HAS_BUFFERED else 2

    bm, th = _select_tiling(M, E, H, wsize, xsize, osize, weight_bufs, budget, n_tc,
                            block_m=block_m, block_h=block_h,
                            force_h_tiling=force_h_tiling)

    cost = pl.CostEstimate(
        flops=int(4 * M * E * H),
        transcendentals=int(M * H),
        bytes_accessed=int(M * E * (xsize + osize) + 2 * E * H * wsize + (E + H) * 4),
    )

    def build(single_buffer):
        if th is None:
            kernel = functools.partial(_ffn_kernel_resident, approx_recip=approx_recip)
            grid_spec = pltpu.PrefetchScalarGridSpec(
                num_scalar_prefetch=0,
                grid=(pl.cdiv(M, bm),),
                in_specs=[
                    pl.BlockSpec((bm, E), lambda i: (i, 0)),               # rows: tiled
                    _const_spec((E, H), lambda i: (0, 0), single_buffer),  # W1^T resident
                    _const_spec((1, H), lambda i: (0, 0), single_buffer),  # b1 resident
                    _const_spec((H, E), lambda i: (0, 0), single_buffer),  # W2^T resident
                    _const_spec((1, E), lambda i: (0, 0), single_buffer),  # b2 resident
                ],
                out_specs=pl.BlockSpec((bm, E), lambda i: (i, 0)),
            )
            dims = ("parallel",)
        else:
            kernel = functools.partial(_ffn_kernel_htiled, approx_recip=approx_recip)
            grid_spec = pltpu.PrefetchScalarGridSpec(
                num_scalar_prefetch=0,
                grid=(pl.cdiv(M, bm), pl.cdiv(H, th)),
                in_specs=[
                    pl.BlockSpec((bm, E), lambda i, h: (i, 0)),            # reused over h
                    pl.BlockSpec((E, th), lambda i, h: (0, h)),
                    pl.BlockSpec((1, th), lambda i, h: (0, h)),
                    pl.BlockSpec((th, E), lambda i, h: (h, 0)),
                    _const_spec((1, E), lambda i, h: (0, 0), single_buffer),
                ],
                out_specs=pl.BlockSpec((bm, E), lambda i, h: (i, 0)),
                scratch_shapes=[pltpu.VMEM((bm, E), jnp.float32)],
            )
            dims = ("parallel", "arbitrary")
        return pl.pallas_call(
            kernel,
            out_shape=jax.ShapeDtypeStruct((M, E), out_dtype),
            grid_spec=grid_spec,
            compiler_params=pltpu.CompilerParams(
                dimension_semantics=dims,
                vmem_limit_bytes=vmem_limit),
            cost_estimate=cost,
        )

    if _HAS_BUFFERED:
        try:
            out = build(True)(x2, w1t, b1, w2t, b2)
        except Exception:
            # Installed jax accepted pipeline_mode at spec construction but not at
            # lowering; fall back to default double-buffering.
            out = build(False)(x2, w1t, b1, w2t, b2)
    else:
        out = build(False)(x2, w1t, b1, w2t, b2)

    return out.reshape(orig_shape[:-1] + (E,))


# ---------------------------------------------------------------------------
# Pure-JAX reference + init (shapes follow nn.Linear in FeedForward.__init__)
# ---------------------------------------------------------------------------
def _reference(x, params):
    h = x @ params["w1"].T + params["b1"]
    h = jax.nn.gelu(h, approximate=False)     # torch.nn.GELU() default (erf form)
    return h @ params["w2"].T + params["b2"]  # Dropout(p=0.0) == identity


def _init_params(key, emb_dim, hidden_dim):
    k1, k2, k3, k4 = jax.random.split(key, 4)
    b1 = 1.0 / (emb_dim ** 0.5)
    b2 = 1.0 / (hidden_dim ** 0.5)
    return {
        "w1": jax.random.uniform(k1, (hidden_dim, emb_dim), jnp.float32, -b1, b1),
        "b1": jax.random.uniform(k2, (hidden_dim,), jnp.float32, -b1, b1),
        "w2": jax.random.uniform(k3, (emb_dim, hidden_dim), jnp.float32, -b2, b2),
        "b2": jax.random.uniform(k4, (emb_dim,), jnp.float32, -b2, b2),
    }


if __name__ == "__main__":
    # Small but lane-aligned shapes (E, H multiples of 128 -> unmasked lane-dense stores).
    B, N, E, H = 2, 8, 128, 256

    key = jax.random.PRNGKey(0)
    kp, kx = jax.random.split(key)
    params = _init_params(kp, E, H)
    x = jax.random.normal(kx, (B, N, E), jnp.float32)

    ref = _reference(x, params)

    # 1) f32 resident-weight path (exact reciprocal in GELU) — tight check.
    prep_f32 = prepare_params(params, compute_dtype=jnp.float32)
    out = jax.block_until_ready(feed_forward(x, prep_f32))
    assert out.shape == (B, N, E)
    assert jnp.allclose(out, ref, atol=1e-4, rtol=1e-4), "f32 resident mismatch"

    # 2) H-tiled accumulator fallback (auto-selected when resident weights exceed the
    #    VMEM budget, e.g. large E/H on v7x) — forced here so it is exercised.
    out_ht = jax.block_until_ready(
        feed_forward(x, prep_f32, force_h_tiling=True, block_h=128))
    assert jnp.allclose(out_ht, ref, atol=1e-4, rtol=1e-4), "f32 H-tiled mismatch"

    # 3) bf16 MXU-operand path (recommended on v5e/v6e/v7x): bf16 operands, f32
    #    accumulation/bias/GELU, approx-reciprocal erf.
    prep_bf16 = prepare_params(params, compute_dtype=jnp.bfloat16)
    out_bf16 = jax.block_until_ready(feed_forward(x, prep_bf16))
    assert jnp.allclose(out_bf16, ref, atol=5e-2, rtol=5e-2), "bf16 mismatch"

    # 4) Ragged row count (no wrapper pad/slice; Pallas masks the edge block).
    x_rag = x[:, :7, :]                      # M = 14 rows, not a multiple of 8
    out_rag = jax.block_until_ready(feed_forward(x_rag, prep_f32))
    assert jnp.allclose(out_rag, _reference(x_rag, params), atol=1e-4, rtol=1e-4), \
        "ragged-M mismatch"

    print("KERNEL_OK")
</pallas_src>

<mosaic_0001>
module attributes {stable_mosaic.version = 11 : i64} {
  func.func @_ffn_kernel_resident(%arg0: i32, %arg1: memref<16x128xf32, #tpu.memory_space<vmem>>, %arg2: memref<128x256xf32, #tpu.memory_space<vmem>>, %arg3: memref<1x256xf32, #tpu.memory_space<vmem>>, %arg4: memref<256x128xf32, #tpu.memory_space<vmem>>, %arg5: memref<1x128xf32, #tpu.memory_space<vmem>>, %arg6: memref<16x128xf32, #tpu.memory_space<vmem>>) attributes {dimension_semantics = [#tpu.dimension_semantics<parallel>], iteration_bounds = array<i64: 1>, scalar_prefetch = 0 : i64, scratch_operands = 0 : i64, tpu.core_type = #tpu.core_type<tc>, window_params = [{transform_indices = @transform_0, window_bounds = array<i64: 16, 128>}, {pipeline_mode = #tpu.pipeline_mode<synchronous>, transform_indices = @transform_1, window_bounds = array<i64: 128, 256>}, {pipeline_mode = #tpu.pipeline_mode<synchronous>, transform_indices = @transform_2, window_bounds = array<i64: 1, 256>}, {pipeline_mode = #tpu.pipeline_mode<synchronous>, transform_indices = @transform_3, window_bounds = array<i64: 256, 128>}, {pipeline_mode = #tpu.pipeline_mode<synchronous>, transform_indices = @transform_4, window_bounds = array<i64: 1, 128>}, {transform_indices = @transform_5, window_bounds = array<i64: 16, 128>}]} {
    %c0 = arith.constant 0 : index
    %c0_0 = arith.constant 0 : index
    %0 = vector.load %arg1[%c0, %c0_0] : memref<16x128xf32, #tpu.memory_space<vmem>>, vector<16x128xf32>
    %c0_1 = arith.constant 0 : index
    %c0_2 = arith.constant 0 : index
    %1 = vector.load %arg2[%c0_1, %c0_2] : memref<128x256xf32, #tpu.memory_space<vmem>>, vector<128x256xf32>
    %cst = arith.constant dense<0.000000e+00> : vector<16x256xf32>
    %2 = tpu.matmul %0, %1, %cst {dimension_numbers = #tpu.dot_dimension_numbers<[1], [0], [0], [1], [0, 0, 1, 1], [], []>} : vector<16x128xf32>, vector<128x256xf32>, vector<16x256xf32> -> vector<16x256xf32>
    %c0_3 = arith.constant 0 : index
    %c0_4 = arith.constant 0 : index
    %3 = vector.load %arg3[%c0_3, %c0_4] : memref<1x256xf32, #tpu.memory_space<vmem>>, vector<1x256xf32>
    %4 = vector.broadcast %3 : vector<1x256xf32> to vector<16x256xf32>
    %5 = arith.addf %2, %4 : vector<16x256xf32>
    %cst_5 = arith.constant 5.000000e-01 : f32
    %6 = vector.broadcast %cst_5 : f32 to vector<16x256xf32>
    %7 = arith.mulf %6, %5 : vector<16x256xf32>
    %cst_6 = arith.constant 0.707106769 : f32
    %8 = vector.broadcast %cst_6 : f32 to vector<16x256xf32>
    %9 = arith.mulf %5, %8 : vector<16x256xf32>
    %10 = math.absf %9 : vector<16x256xf32>
    %cst_7 = arith.constant 0.327591091 : f32
    %11 = vector.broadcast %cst_7 : f32 to vector<16x256xf32>
    %12 = arith.mulf %11, %10 : vector<16x256xf32>
    %cst_8 = arith.constant 1.000000e+00 : f32
    %13 = vector.broadcast %cst_8 : f32 to vector<16x256xf32>
    %14 = arith.addf %13, %12 : vector<16x256xf32>
    %cst_9 = arith.constant 1.000000e+00 : f32
    %15 = vector.broadcast %cst_9 : f32 to vector<16x256xf32>
    %16 = arith.divf %15, %14 : vector<16x256xf32>
    %cst_10 = arith.constant 1.06140542 : f32
    %17 = vector.broadcast %cst_10 : f32 to vector<16x256xf32>
    %18 = arith.mulf %16, %17 : vector<16x256xf32>
    %cst_11 = arith.constant -1.45315206 : f32
    %19 = vector.broadcast %cst_11 : f32 to vector<16x256xf32>
    %20 = arith.addf %19, %18 : vector<16x256xf32>
    %21 = arith.mulf %16, %20 : vector<16x256xf32>
    %cst_12 = arith.constant 1.42141378 : f32
    %22 = vector.broadcast %cst_12 : f32 to vector<16x256xf32>
    %23 = arith.addf %22, %21 : vector<16x256xf32>
    %24 = arith.mulf %16, %23 : vector<16x256xf32>
    %cst_13 = arith.constant -0.284496725 : f32
    %25 = vector.broadcast %cst_13 : f32 to vector<16x256xf32>
    %26 = arith.addf %25, %24 : vector<16x256xf32>
    %27 = arith.mulf %16, %26 : vector<16x256xf32>
    %cst_14 = arith.constant 0.254829586 : f32
    %28 = vector.broadcast %cst_14 : f32 to vector<16x256xf32>
    %29 = arith.addf %28, %27 : vector<16x256xf32>
    %30 = arith.mulf %16, %29 : vector<16x256xf32>
    %cst_15 = arith.constant 0.000000e+00 : f32
    %31 = vector.broadcast %cst_15 : f32 to vector<16x256xf32>
    %32 = arith.subf %31, %10 : vector<16x256xf32>
    %33 = arith.mulf %32, %10 : vector<16x256xf32>
    %34 = math.exp %33 : vector<16x256xf32>
    %35 = arith.mulf %30, %34 : vector<16x256xf32>
    %cst_16 = arith.constant 1.000000e+00 : f32
    %36 = vector.broadcast %cst_16 : f32 to vector<16x256xf32>
    %37 = arith.subf %36, %35 : vector<16x256xf32>
    %cst_17 = arith.constant 0.000000e+00 : f32
    %38 = vector.broadcast %cst_17 : f32 to vector<16x256xf32>
    %39 = arith.cmpf oge, %9, %38 : vector<16x256xf32>
    %cst_18 = arith.constant 0.000000e+00 : f32
    %40 = vector.broadcast %cst_18 : f32 to vector<16x256xf32>
    %41 = arith.subf %40, %37 : vector<16x256xf32>
    %42 = arith.select %39, %37, %41 : vector<16x256xi1>, vector<16x256xf32>
    %cst_19 = arith.constant 1.000000e+00 : f32
    %43 = vector.broadcast %cst_19 : f32 to vector<16x256xf32>
    %44 = arith.addf %43, %42 : vector<16x256xf32>
    %45 = arith.mulf %7, %44 : vector<16x256xf32>
    %c0_20 = arith.constant 0 : index
    %c0_21 = arith.constant 0 : index
    %46 = vector.load %arg4[%c0_20, %c0_21] : memref<256x128xf32, #tpu.memory_space<vmem>>, vector<256x128xf32>
    %cst_22 = arith.constant dense<0.000000e+00> : vector<16x128xf32>
    %47 = tpu.matmul %45, %46, %cst_22 {dimension_numbers = #tpu.dot_dimension_numbers<[1], [0], [0], [1], [0, 0, 1, 1], [], []>} : vector<16x256xf32>, vector<256x128xf32>, vector<16x128xf32> -> vector<16x128xf32>
    %c0_23 = arith.constant 0 : index
    %c0_24 = arith.constant 0 : index
    %48 = vector.load %arg5[%c0_23, %c0_24] : memref<1x128xf32, #tpu.memory_space<vmem>>, vector<1x128xf32>
    %49 = vector.broadcast %48 : vector<1x128xf32> to vector<16x128xf32>
    %50 = arith.addf %47, %49 : vector<16x128xf32>
    %c0_25 = arith.constant 0 : index
    %c0_26 = arith.constant 0 : index
    %51 = vector.load %arg6[%c0_25, %c0_26] : memref<16x128xf32, #tpu.memory_space<vmem>>, vector<16x128xf32>
    tpu.vector_store %arg6[%c0_25, %c0_26], %50 {strides = array<i32>} : memref<16x128xf32, #tpu.memory_space<vmem>>, vector<16x128xf32>,
    return
  }
  func.func @transform_0(%arg0: i32) -> (i32, i32) {
    %c0_i32 = arith.constant 0 : i32
    %c0_i32_0 = arith.constant 0 : i32
    return %arg0, %c0_i32 : i32, i32
  }
  func.func @transform_1(%arg0: i32) -> (i32, i32) {
    %c0_i32 = arith.constant 0 : i32
    %c0_i32_0 = arith.constant 0 : i32
    %c0_i32_1 = arith.constant 0 : i32
    return %c0_i32, %c0_i32_0 : i32, i32
  }
  func.func @transform_2(%arg0: i32) -> (i32, i32) {
    %c0_i32 = arith.constant 0 : i32
    %c0_i32_0 = arith.constant 0 : i32
    %c0_i32_1 = arith.constant 0 : i32
    return %c0_i32, %c0_i32_0 : i32, i32
  }
  func.func @transform_3(%arg0: i32) -> (i32, i32) {
    %c0_i32 = arith.constant 0 : i32
    %c0_i32_0 = arith.constant 0 : i32
    %c0_i32_1 = arith.constant 0 : i32
    return %c0_i32, %c0_i32_0 : i32, i32
  }
  func.func @transform_4(%arg0: i32) -> (i32, i32) {
    %c0_i32 = arith.constant 0 : i32
    %c0_i32_0 = arith.constant 0 : i32
    %c0_i32_1 = arith.constant 0 : i32
    return %c0_i32, %c0_i32_0 : i32, i32
  }
  func.func @transform_5(%arg0: i32) -> (i32, i32) {
    %c0_i32 = arith.constant 0 : i32
    %c0_i32_0 = arith.constant 0 : i32
    return %arg0, %c0_i32 : i32, i32
  }
}

module attributes {stable_mosaic.version = 11 : i64} {
  func.func @_ffn_kernel_resident(%arg0: i32, %arg1: memref<16x128xf32, #tpu.memory_space<vmem>>, %arg2: memref<128x256xf32, #tpu.memory_space<vmem>>, %arg3: memref<1x256xf32, #tpu.memory_space<vmem>>, %arg4: memref<256x128xf32, #tpu.memory_space<vmem>>, %arg5: memref<1x128xf32, #tpu.memory_space<vmem>>, %arg6: memref<16x128xf32, #tpu.memory_space<vmem>>) attributes {dimension_semantics = [#tpu.dimension_semantics<parallel>], iteration_bounds = array<i64: 1>, scalar_prefetch = 0 : i64, scratch_operands = 0 : i64, tpu.core_type = #tpu.core_type<tc>, window_params = [{transform_indices = @transform_0, window_bounds = array<i64: 16, 128>}, {pipeline_mode = #tpu.pipeline_mode<synchronous>, transform_indices = @transform_1, window_bounds = array<i64: 128, 256>}, {pipeline_mode = #tpu.pipeline_mode<synchronous>, transform_indices = @transform_2, window_bounds = array<i64: 1, 256>}, {pipeline_mode = #tpu.pipeline_mode<synchronous>, transform_indices = @transform_3, window_bounds = array<i64: 256, 128>}, {pipeline_mode = #tpu.pipeline_mode<synchronous>, transform_indices = @transform_4, window_bounds = array<i64: 1, 128>}, {transform_indices = @transform_5, window_bounds = array<i64: 16, 128>}]} {
    %c0 = arith.constant 0 : index
    %c0_0 = arith.constant 0 : index
    %0 = vector.load %arg1[%c0, %c0_0] : memref<16x128xf32, #tpu.memory_space<vmem>>, vector<16x128xf32>
    %c0_1 = arith.constant 0 : index
    %c0_2 = arith.constant 0 : index
    %1 = vector.load %arg2[%c0_1, %c0_2] : memref<128x256xf32, #tpu.memory_space<vmem>>, vector<128x256xf32>
    %cst = arith.constant dense<0.000000e+00> : vector<16x256xf32>
    %2 = tpu.matmul %0, %1, %cst {dimension_numbers = #tpu.dot_dimension_numbers<[1], [0], [0], [1], [0, 0, 1, 1], [], []>} : vector<16x128xf32>, vector<128x256xf32>, vector<16x256xf32> -> vector<16x256xf32>
    %c0_3 = arith.constant 0 : index
    %c0_4 = arith.constant 0 : index
    %3 = vector.load %arg3[%c0_3, %c0_4] : memref<1x256xf32, #tpu.memory_space<vmem>>, vector<1x256xf32>
    %4 = vector.broadcast %3 : vector<1x256xf32> to vector<16x256xf32>
    %5 = arith.addf %2, %4 : vector<16x256xf32>
    %cst_5 = arith.constant 5.000000e-01 : f32
    %6 = vector.broadcast %cst_5 : f32 to vector<16x256xf32>
    %7 = arith.mulf %6, %5 : vector<16x256xf32>
    %cst_6 = arith.constant 0.707106769 : f32
    %8 = vector.broadcast %cst_6 : f32 to vector<16x256xf32>
    %9 = arith.mulf %5, %8 : vector<16x256xf32>
    %10 = math.absf %9 : vector<16x256xf32>
    %cst_7 = arith.constant 0.327591091 : f32
    %11 = vector.broadcast %cst_7 : f32 to vector<16x256xf32>
    %12 = arith.mulf %11, %10 : vector<16x256xf32>
    %cst_8 = arith.constant 1.000000e+00 : f32
    %13 = vector.broadcast %cst_8 : f32 to vector<16x256xf32>
    %14 = arith.addf %13, %12 : vector<16x256xf32>
    %cst_9 = arith.constant 1.000000e+00 : f32
    %15 = vector.broadcast %cst_9 : f32 to vector<16x256xf32>
    %16 = arith.divf %15, %14 : vector<16x256xf32>
    %cst_10 = arith.constant 1.06140542 : f32
    %17 = vector.broadcast %cst_10 : f32 to vector<16x256xf32>
    %18 = arith.mulf %16, %17 : vector<16x256xf32>
    %cst_11 = arith.constant -1.45315206 : f32
    %19 = vector.broadcast %cst_11 : f32 to vector<16x256xf32>
    %20 = arith.addf %19, %18 : vector<16x256xf32>
    %21 = arith.mulf %16, %20 : vector<16x256xf32>
    %cst_12 = arith.constant 1.42141378 : f32
    %22 = vector.broadcast %cst_12 : f32 to vector<16x256xf32>
    %23 = arith.addf %22, %21 : vector<16x256xf32>
    %24 = arith.mulf %16, %23 : vector<16x256xf32>
    %cst_13 = arith.constant -0.284496725 : f32
    %25 = vector.broadcast %cst_13 : f32 to vector<16x256xf32>
    %26 = arith.addf %25, %24 : vector<16x256xf32>
    %27 = arith.mulf %16, %26 : vector<16x256xf32>
    %cst_14 = arith.constant 0.254829586 : f32
    %28 = vector.broadcast %cst_14 : f32 to vector<16x256xf32>
    %29 = arith.addf %28, %27 : vector<16x256xf32>
    %30 = arith.mulf %16, %29 : vector<16x256xf32>
    %cst_15 = arith.constant 0.000000e+00 : f32
    %31 = vector.broadcast %cst_15 : f32 to vector<16x256xf32>
    %32 = arith.subf %31, %10 : vector<16x256xf32>
    %33 = arith.mulf %32, %10 : vector<16x256xf32>
    %34 = math.exp %33 : vector<16x256xf32>
    %35 = arith.mulf %30, %34 : vector<16x256xf32>
    %cst_16 = arith.constant 1.000000e+00 : f32
    %36 = vector.broadcast %cst_16 : f32 to vector<16x256xf32>
    %37 = arith.subf %36, %35 : vector<16x256xf32>
    %cst_17 = arith.constant 0.000000e+00 : f32
    %38 = vector.broadcast %cst_17 : f32 to vector<16x256xf32>
    %39 = arith.cmpf oge, %9, %38 : vector<16x256xf32>
    %cst_18 = arith.constant 0.000000e+00 : f32
    %40 = vector.broadcast %cst_18 : f32 to vector<16x256xf32>
    %41 = arith.subf %40, %37 : vector<16x256xf32>
    %42 = arith.select %39, %37, %41 : vector<16x256xi1>, vector<16x256xf32>
    %cst_19 = arith.constant 1.000000e+00 : f32
    %43 = vector.broadcast %cst_19 : f32 to vector<16x256xf32>
    %44 = arith.addf %43, %42 : vector<16x256xf32>
    %45 = arith.mulf %7, %44 : vector<16x256xf32>
    %c0_20 = arith.constant 0 : index
    %c0_21 = arith.constant 0 : index
    %46 = vector.load %arg4[%c0_20, %c0_21] : memref<256x128xf32, #tpu.memory_space<vmem>>, vector<256x128xf32>
    %cst_22 = arith.constant dense<0.000000e+00> : vector<16x128xf32>
    %47 = tpu.matmul %45, %46, %cst_22 {dimension_numbers = #tpu.dot_dimension_numbers<[1], [0], [0], [1], [0, 0, 1, 1], [], []>} : vector<16x256xf32>, vector<256x128xf32>, vector<16x128xf32> -> vector<16x128xf32>
    %c0_23 = arith.constant 0 : index
    %c0_24 = arith.constant 0 : index
    %48 = vector.load %arg5[%c0_23, %c0_24] : memref<1x128xf32, #tpu.memory_space<vmem>>, vector<1x128xf32>
    %49 = vector.broadcast %48 : vector<1x128xf32> to vector<16x128xf32>
    %50 = arith.addf %47, %49 : vector<16x128xf32>
    %c0_25 = arith.constant 0 : index
    %c0_26 = arith.constant 0 : index
    %51 = vector.load %arg6[%c0_25, %c0_26] : memref<16x128xf32, #tpu.memory_space<vmem>>, vector<16x128xf32>
    tpu.vector_store %arg6[%c0_25, %c0_26], %50 {strides = array<i32>} : memref<16x128xf32, #tpu.memory_space<vmem>>, vector<16x128xf32>,
    return
  }
  func.func @transform_0(%arg0: i32) -> (i32, i32) {
    %c0_i32 = arith.constant 0 : i32
    %c0_i32_0 = arith.constant 0 : i32
    return %arg0, %c0_i32 : i32, i32
  }
  func.func @transform_1(%arg0: i32) -> (i32, i32) {
    %c0_i32 = arith.constant 0 : i32
    %c0_i32_0 = arith.constant 0 : i32
    %c0_i32_1 = arith.constant 0 : i32
    return %c0_i32, %c0_i32_0 : i32, i32
  }
  func.func @transform_2(%arg0: i32) -> (i32, i32) {
    %c0_i32 = arith.constant 0 : i32
    %c0_i32_0 = arith.constant 0 : i32
    %c0_i32_1 = arith.constant 0 : i32
    return %c0_i32, %c0_i32_0 : i32, i32
  }
  func.func @transform_3(%arg0: i32) -> (i32, i32) {
    %c0_i32 = arith.constant 0 : i32
    %c0_i32_0 = arith.constant 0 : i32
    %c0_i32_1 = arith.constant 0 : i32
    return %c0_i32, %c0_i32_0 : i32, i32
  }
  func.func @transform_4(%arg0: i32) -> (i32, i32) {
    %c0_i32 = arith.constant 0 : i32
    %c0_i32_0 = arith.constant 0 : i32
    %c0_i32_1 = arith.constant 0 : i32
    return %c0_i32, %c0_i32_0 : i32, i32
  }
  func.func @transform_5(%arg0: i32) -> (i32, i32) {
    %c0_i32 = arith.constant 0 : i32
    %c0_i32_0 = arith.constant 0 : i32
    return %arg0, %c0_i32 : i32, i32
  }
}

</mosaic_0001>

<bundles_post_ra>
// kernel: tpu_custom_call.1
= control target key start
LH: loop header
LB: loop body
LE: loop exit
PB: predicated region body
PF: predicated region fallthrough
CT: control target
= control target key end

     0   :  { %10 = vsyncpa [#allocation3], 0  ;;  %s785_s0 = inlined_call_operand.hbm [shape: f32[16,128], index: 0, kind: input, shape index: {}]   ;;  %s786_s1 = inlined_call_operand.hbm [shape: f32[128,256], index: 1, kind: input, shape index: {}]   ;;  %s787_s2 = inlined_call_operand.vmem [shape: f32[1,256], index: 2, kind: input, shape index: {}]   ;;  %s788_s3 = inlined_call_operand.hbm [shape: f32[256,128], index: 3, kind: input, shape index: {}]   ;;  %s789_s4 = inlined_call_operand.vmem [shape: f32[1,128], index: 4, kind: input, shape index: {}]   ;;  %s790_s5 = inlined_call_operand.hbm [shape: f32[16,128], index: 5, kind: output, shape index: {}]  }
   0x1   :  { %11 = vsyncpa [#allocation6], 0 }
   0x2   :  { %12 = vsyncpa [#allocation4], 0  ;;  %s649_s18 = smov [#allocation5]   ;;  %s555_s22 = scalar_lea.hbm %s786_s1, 4096 }
   0x3   :  { %s30_s19 = sshll.u32 %s649_s18, 4  ;;  %p556_p0 = scmp.ne.s32.totalorder %s786_s1, %s555_s22  ;;  %s31_s19 = int_to_ptr.vmem [resolvable:$true] %s30_s19 }
   0x4   :  { %p559_p1 = scmp.lt.u32.totalorder %s555_s22, %s786_s1 }
   0x6   :  { %p561_p2 = pnand %p559_p1, %p556_p0 }
   0x8   :  { %564 = shalt.err (!%p561_p2)
}
   0x9   :  { %s565_s27 = scalar_lea.vmem %s31_s19, 4096  ;;  %p570_p4 = scmp.lt.s32.totalorder %s31_s19, %s31_s19 }
   0xa   :  { %p566_p3 = scmp.ne.s32.totalorder %s31_s19, %s565_s27  ;;  %p571_p5 = scmp.lt.s32.totalorder %s565_s27, %s565_s27 }
   0xc   :  { %p572_p6 = por %p571_p5, %p570_p4 }
   0xe   :  { %p573_p7 = pnand %p572_p6, %p566_p3 }
  0x10   :  { %576 = shalt.err (!%p573_p7)
}
  0x11   :  { %s650_s28 = smov 256   ;;  %s651_s29 = smov 16  }
  0x12   :  { %36 = dma.hbm_to_vmem [thread:$0]  %s786_s1, 4096, %s31_s19, [#allocation6], %s650_s28, %s650_s28, %s651_s29  }
  0x13   :  { %s652_s7 = smov [#allocation2]   ;;  %s577_s11 = scalar_lea.hbm %s785_s0, 256 }
  0x14   :  { %s18_s8 = sshll.u32 %s652_s7, 4  ;;  %p578_p8 = scmp.ne.s32.totalorder %s785_s0, %s577_s11  ;;  %s19_s8 = int_to_ptr.vmem [resolvable:$true] %s18_s8 }
  0x15   :  { %p581_p9 = scmp.lt.u32.totalorder %s577_s11, %s785_s0 }
  0x17   :  { %p583_p10 = pnand %p581_p9, %p578_p8 }
  0x19   :  { %586 = shalt.err (!%p583_p10)
}
  0x1a   :  { %s587_s16 = scalar_lea.vmem %s19_s8, 256  ;;  %p592_p12 = scmp.lt.s32.totalorder %s19_s8, %s19_s8 }
  0x1b   :  { %p588_p11 = scmp.ne.s32.totalorder %s19_s8, %s587_s16  ;;  %p593_p13 = scmp.lt.s32.totalorder %s587_s16, %s587_s16 }
  0x1d   :  { %p594_p0 = por %p593_p13, %p592_p12 }
  0x1f   :  { %p595_p1 = pnand %p594_p0, %p588_p11 }
  0x21   :  { %598 = shalt.err (!%p595_p1)
}
  0x22   :  { %s653_s1 = smov 128   ;;  %s654_s17 = smov 8  }
  0x23   :  { %24 = dma.hbm_to_vmem [thread:$0]  %s785_s0, 256, %s19_s8, [#allocation3], %s653_s1, %s653_s1, %s654_s17  }
  0x24   :  { %s655_s20 = smov [#allocation7]   ;;  %s599_s24 = scalar_lea.hbm %s788_s3, 4096 }
  0x25   :  { %s44_s21 = sshll.u32 %s655_s20, 4  ;;  %p600_p2 = scmp.ne.s32.totalorder %s788_s3, %s599_s24  ;;  %s45_s21 = int_to_ptr.vmem [resolvable:$true] %s44_s21 }
  0x26   :  { %p603_p3 = scmp.lt.u32.totalorder %s599_s24, %s788_s3 }
  0x28   :  { %p605_p4 = pnand %p603_p3, %p600_p2 }
  0x2a   :  { %608 = shalt.err (!%p605_p4)
}
  0x2b   :  { %s609_s29 = scalar_lea.vmem %s45_s21, 4096  ;;  %p614_p6 = scmp.lt.s32.totalorder %s45_s21, %s45_s21 }
  0x2c   :  { %p610_p5 = scmp.ne.s32.totalorder %s45_s21, %s609_s29  ;;  %p615_p7 = scmp.lt.s32.totalorder %s609_s29, %s609_s29 }
  0x2e   :  { %p616_p8 = por %p615_p7, %p614_p6 }
  0x30   :  { %p617_p9 = pnand %p616_p8, %p610_p5 }
  0x32   :  { %620 = shalt.err (!%p617_p9)
}
  0x33   :  { %50 = dma.hbm_to_vmem [thread:$0]  %s788_s3, 4096, %s45_s21, [#allocation6], %s653_s1, %s653_s1, %s654_s17  }
  0x34   :  { %643 = dma.done.wait [#allocation3], 256  }
  0x35   :  { %644 = vsyncadd [#allocation3], 4294967040 }
  0x36   :  { %645 = dma.done.wait [#allocation6], 8192  }
  0x37   :  { %646 = vsyncadd [#allocation6], 4294959104  ;;  %v656_v0 = vmov 0.0   ;;  %v65_v1 = vld [vmem:[#allocation5 + $0x8] sm:$0xff]  ;;  %v67_v2 = vld [vmem:[#allocation5 + $0x18] sm:$0xff]  ;;  %s657_s8 = smov [#allocation8]  }
  0x38   :  { %172 = vmatprep.mubr.f32.mxu0 %v656_v0  ;;  %v64_v3 = vld [vmem:[#allocation5] sm:$0xff]  ;;  %v466_v4 = vpack.c.bf16 %v67_v2, %v65_v1  ;;  %v66_v5 = vld [vmem:[#allocation5 + $0x10] sm:$0xff]  ;;  %v69_v6 = vld [vmem:[#allocation5 + $0x28] sm:$0xff]  ;;  %s414_s9 = sshll.u32 %s657_s8, 4  ;;  %s415_s9 = int_to_ptr.vmem [resolvable:$true] %s414_s9 }
  0x39   :  { %v71_v7 = vld [vmem:[#allocation5 + $0x38] sm:$0xff]  ;;  %v468_v8 = vpack.c.bf16 %v66_v5, %v64_v3  ;;  %v68_v10 = vld [vmem:[#allocation5 + $0x20] sm:$0xff]  ;;  %v70_v11 = vld [vmem:[#allocation5 + $0x30] sm:$0xff]  ;;  %s621_s10 = scalar_lea.vmem %s415_s9, 256  ;;  %p626_p11 = scmp.lt.s32.totalorder %s415_s9, %s415_s9 }
  0x3a   :  { %v470_v9 = vpack.c.bf16 %v71_v7, %v69_v6  ;;  %v73_v12 = vld [vmem:[#allocation5 + $0x48] sm:$0xff]  ;;  %467 = vmatprep.subr.bf16.mxu0 %v466_v4  ;;  %v75_v13 = vld [vmem:[#allocation5 + $0x58] sm:$0xff]  ;;  %v472_v14 = vpack.c.bf16 %v70_v11, %v68_v10  ;;  %v72_v16 = vld [vmem:[#allocation5 + $0x40] sm:$0xff]  ;;  %p622_p10 = scmp.ne.s32.totalorder %s415_s9, %s621_s10  ;;  %p627_p12 = scmp.lt.s32.totalorder %s621_s10, %s621_s10 }
  0x3b   :  { %469 = vmatpush1.bf16.msra.mxu0 %v468_v8  ;;  %v474_v15 = vpack.c.bf16 %v75_v13, %v73_v12  ;;  %v74_v17 = vld [vmem:[#allocation5 + $0x50] sm:$0xff]  ;;  %v77_v18 = vld [vmem:[#allocation5 + $0x68] sm:$0xff]  ;;  %v79_v19 = vld [vmem:[#allocation5 + $0x78] sm:$0xff] }
  0x3c   :  { %471 = vmatprep.subr.bf16.mxu0 %v470_v9  ;;  %v476_v20 = vpack.c.bf16 %v74_v17, %v72_v16  ;;  %v478_v21 = vpack.c.bf16 %v79_v19, %v77_v18  ;;  %v76_v22 = vld [vmem:[#allocation5 + $0x60] sm:$0xff]  ;;  %v78_v23 = vld [vmem:[#allocation5 + $0x70] sm:$0xff]  ;;  %v81_v24 = vld [vmem:[#allocation5 + $0x88] sm:$0xff]  ;;  %p628_p13 = por %p627_p12, %p626_p11 }
  0x3d   :  { %v83_v25 = vld [vmem:[#allocation5 + $0x98] sm:$0xff]  ;;  %v480_v26 = vpack.c.bf16 %v78_v23, %v76_v22  ;;  %v80_v28 = vld [vmem:[#allocation5 + $0x80] sm:$0xff]  ;;  %v82_v29 = vld [vmem:[#allocation5 + $0x90] sm:$0xff] }
  0x3e   :  { %v482_v27 = vpack.c.bf16 %v83_v25, %v81_v24  ;;  %v85_v30 = vld [vmem:[#allocation5 + $0xa8] sm:$0xff]  ;;  %v87_v31 = vld [vmem:[#allocation5 + $0xb8] sm:$0xff]  ;;  %v484_v32 = vpack.c.bf16 %v82_v29, %v80_v28  ;;  %v84_v34 = vld [vmem:[#allocation5 + $0xa0] sm:$0xff]  ;;  %p629_p0 = pnand %p628_p13, %p622_p10 }
  0x3f   :  { %473 = vmatpush1.bf16.msra.mxu0 %v472_v14  ;;  %v486_v33 = vpack.c.bf16 %v87_v31, %v85_v30  ;;  %v86_v35 = vld [vmem:[#allocation5 + $0xb0] sm:$0xff]  ;;  %v89_v36 = vld [vmem:[#allocation5 + $0xc8] sm:$0xff]  ;;  %v91_v37 = vld [vmem:[#allocation5 + $0xd8] sm:$0xff] }
  0x40   :  { %475 = vmatprep.subr.bf16.mxu0 %v474_v15  ;;  %v488_v38 = vpack.c.bf16 %v86_v35, %v84_v34  ;;  %v490_v39 = vpack.c.bf16 %v91_v37, %v89_v36  ;;  %v88_v40 = vld [vmem:[#allocation5 + $0xc0] sm:$0xff]  ;;  %v90_v41 = vld [vmem:[#allocation5 + $0xd0] sm:$0xff]  ;;  %v93_v42 = vld [vmem:[#allocation5 + $0xe8] sm:$0xff]  ;;  %v98_v35 = vlaneseq }
  0x41   :  { %v95_v43 = vld [vmem:[#allocation5 + $0xf8] sm:$0xff]  ;;  %v492_v44 = vpack.c.bf16 %v90_v41, %v88_v40  ;;  %v92_v46 = vld [vmem:[#allocation5 + $0xe0] sm:$0xff]  ;;  %v94_v47 = vld [vmem:[#allocation5 + $0xf0] sm:$0xff] }
  0x42   :  { %v494_v45 = vpack.c.bf16 %v95_v43, %v93_v42  ;;  %v496_v48 = vpack.c.bf16 %v94_v47, %v92_v46  ;;  %v62_v49 = vld [vmem:[#allocation2] sm:$0xff]  ;;  %v63_v50 = vld [vmem:[#allocation2 + $0x8] sm:$0xff]  ;;  %v309_v51 = vld [vmem:[#allocation7 + $0x80] sm:$0xff]  ;;  %v99_v36 = vshrl.u32 %v98_v35, 7 }
  0x43   :  { %477 = vmatpush1.bf16.msra.mxu0 %v476_v20  ;;  %v310_v52 = vld [vmem:[#allocation7 + $0x88] sm:$0xff]  ;;  %v293_v53 = vld [vmem:[#allocation7] sm:$0xff]  ;;  %v311_v56 = vld [vmem:[#allocation7 + $0x90] sm:$0xff] }
  0x44   :  { %479 = vmatprep.subr.bf16.mxu0 %v478_v21  ;;  %v498_v54 = vpack.c.bf16 %v310_v52, %v309_v51  ;;  %v294_v55 = vld [vmem:[#allocation7 + $0x8] sm:$0xff]  ;;  %v312_v57 = vld [vmem:[#allocation7 + $0x98] sm:$0xff]  ;;  %v295_v60 = vld [vmem:[#allocation7 + $0x10] sm:$0xff]  ;;  %v100_v37 = vsub.s32 0, %v99_v36 }
  0x45   :  { %v500_v58 = vpack.c.bf16 %v294_v55, %v293_v53  ;;  %v502_v59 = vpack.c.bf16 %v312_v57, %v311_v56  ;;  %v296_v61 = vld [vmem:[#allocation7 + $0x18] sm:$0xff]  ;;  %v313_v62 = vld [vmem:[#allocation7 + $0xa0] sm:$0xff]  ;;  %v314_v63 = vld [vmem:[#allocation7 + $0xa8] sm:$0xff] }
  0x46   :  { %499 = vmatprep.subr.bf16.mxu1 %v498_v54  ;;  %v504_v1 = vpack.c.bf16 %v296_v61, %v295_v60  ;;  %v297_v2 = vld [vmem:[#allocation7 + $0x20] sm:$0xff]  ;;  %v298_v3 = vld [vmem:[#allocation7 + $0x28] sm:$0xff]  ;;  %v315_v4 = vld [vmem:[#allocation7 + $0xb0] sm:$0xff] }
  0x47   :  { %481 = vmatpush1.bf16.msra.mxu0 %v480_v26  ;;  %501 = vmatpush3.bf16.msra.mxu1 %v500_v58  ;;  %v316_v5 = vld [vmem:[#allocation7 + $0xb8] sm:$0xff]  ;;  %v508_v6 = vpack.c.bf16 %v298_v3, %v297_v2  ;;  %v299_v8 = vld [vmem:[#allocation7 + $0x30] sm:$0xff]  ;;  %v317_v10 = vld [vmem:[#allocation7 + $0xc0] sm:$0xff] }
  0x48   :  { %483 = vmatprep.subr.bf16.mxu0 %v482_v27  ;;  %503 = vmatprep.subr.bf16.mxu1 %v502_v59  ;;  %v510_v7 = vpack.c.bf16 %v316_v5, %v315_v4  ;;  %v300_v9 = vld [vmem:[#allocation7 + $0x38] sm:$0xff]  ;;  %v318_v11 = vld [vmem:[#allocation7 + $0xc8] sm:$0xff]  ;;  %v301_v14 = vld [vmem:[#allocation7 + $0x40] sm:$0xff] }
  0x49   :  { %v512_v12 = vpack.c.bf16 %v300_v9, %v299_v8  ;;  %v514_v13 = vpack.c.bf16 %v318_v11, %v317_v10  ;;  %v302_v15 = vld [vmem:[#allocation7 + $0x48] sm:$0xff]  ;;  %v319_v16 = vld [vmem:[#allocation7 + $0xd0] sm:$0xff]  ;;  %v320_v17 = vld [vmem:[#allocation7 + $0xd8] sm:$0xff] }
  0x4a   :  { %v516_v18 = vpack.c.bf16 %v302_v15, %v301_v14  ;;  %v518_v19 = vpack.c.bf16 %v320_v17, %v319_v16  ;;  %v303_v20 = vld [vmem:[#allocation7 + $0x50] sm:$0xff]  ;;  %v304_v21 = vld [vmem:[#allocation7 + $0x58] sm:$0xff]  ;;  %v321_v22 = vld [vmem:[#allocation7 + $0xe0] sm:$0xff] }
  0x4b   :  { %485 = vmatpush1.bf16.msra.mxu0 %v484_v32  ;;  %505 = vmatpush3.bf16.msra.mxu1 %v504_v1  ;;  %v322_v23 = vld [vmem:[#allocation7 + $0xe8] sm:$0xff]  ;;  %v520_v24 = vpack.c.bf16 %v304_v21, %v303_v20  ;;  %v305_v26 = vld [vmem:[#allocation7 + $0x60] sm:$0xff]  ;;  %v323_v28 = vld [vmem:[#allocation7 + $0xf0] sm:$0xff] }
  0x4c   :  { %487 = vmatprep.subr.bf16.mxu0 %v486_v33  ;;  %v522_v25 = vpack.c.bf16 %v322_v23, %v321_v22  ;;  %v306_v27 = vld [vmem:[#allocation7 + $0x68] sm:$0xff]  ;;  %v324_v29 = vld [vmem:[#allocation7 + $0xf8] sm:$0xff]  ;;  %v307_v32 = vld [vmem:[#allocation7 + $0x70] sm:$0xff] }
  0x4d   :  { %v524_v30 = vpack.c.bf16 %v306_v27, %v305_v26  ;;  %v526_v31 = vpack.c.bf16 %v324_v29, %v323_v28  ;;  %v308_v33 = vld [vmem:[#allocation7 + $0x78] sm:$0xff] }
  0x4e   :  { %v528_v34 = vpack.c.bf16 %v308_v33, %v307_v32 }
  0x4f   :  { %489 = vmatpush1.bf16.msra.mxu0 %v488_v38  ;;  %v96_v38 = vld [vmem:[%s787_s2] sm:$0x3] }
  0x50   :  { %491 = vmatprep.subr.bf16.mxu0 %v490_v39  ;;  %v104_v39 = vsub.s32 1, %v99_v36  ;;  %v101_v40 = vrot.slane %v96_v38, %v100_v37 }
  0x52   :  { %v105_v41 = vrot.slane %v96_v38, %v104_v39 }
  0x53   :  { %493 = vmatpush1.bf16.msra.mxu0 %v492_v44 }
  0x54   :  { %495 = vmatprep.subr.bf16.mxu0 %v494_v45 }
  0x57   :  { %497 = vmatpush1.bf16.msra.mxu0 %v496_v48 }
  0x5a   :  { %173 = vmatmul.mubr.f32.vlgmr.msra.gmra.mrb[0].mxu0 %v62_v49 }
  0x5b   :  { %178 = vmatprep.mubr.f32.mxu0 %v656_v0  ;;  %v506_v0 = vpack.c.bf16 %v314_v63, %v313_v62 }
  0x5d   :  { %507 = vmatprep.subr.bf16.mxu1 %v506_v0 }
  0x5e   :  { %179 = vmatmul.mubr.f32.gmra.mrb[2].mxu0 %v63_v50  ;;  %509 = vmatpush3.bf16.msra.mxu1 %v508_v6 }
  0x5f   :  { %511 = vmatprep.subr.bf16.mxu1 %v510_v7 }
  0x62   :  { %513 = vmatpush3.bf16.msra.mxu1 %v512_v12 }
  0x63   :  { %515 = vmatprep.subr.bf16.mxu1 %v514_v13 }
  0x66   :  { %517 = vmatpush3.bf16.msra.mxu1 %v516_v18 }
  0x67   :  { %519 = vmatprep.subr.bf16.mxu1 %v518_v19 }
  0x6a   :  { %521 = vmatpush3.bf16.msra.mxu1 %v520_v24 }
  0x6b   :  { %523 = vmatprep.subr.bf16.mxu1 %v522_v25 }
  0x6e   :  { %525 = vmatpush3.bf16.msra.mxu1 %v524_v30 }
  0x6f   :  { %527 = vmatprep.subr.bf16.mxu1 %v526_v31 }
  0x72   :  { %529 = vmatpush3.bf16.msra.mxu1 %v528_v34 }
 0x12d   :  { %v174_v42 = vpop.f32.mrb[0].mxu0 }
 0x12e   :  { %v735_v43 = vadd.f32 %v174_v42, %v101_v40  ;;  %v176_v44 = vpop.f32.mrb[1].mxu0 }
 0x12f   :  { %v737_v45 = vadd.f32 %v176_v44, %v105_v41 }
 0x130   :  { %v740_v46 = vmul.f32 0.70710677, %v735_v43 }
 0x131   :  { %v743_v47 = vmul.f32 0.70710677, %v737_v45  ;;  %v180_v48 = vpop.f32.mrb[2].mxu0 }
 0x132   :  { %v193_v49 = vand.u32 2147483647, %v740_v46  ;;  %v746_v50 = vadd.f32 %v180_v48, %v101_v40  ;;  %v182_v51 = vpop.f32.mrb[3].mxu0  ;;  %vm273_vm0 = vcmp.ge.f32.partialorder %v740_v46, 0.0 }
 0x133   :  { %v194_v52 = vand.u32 2147483647, %v743_v47  ;;  %v749_v53 = vadd.f32 %v182_v51, %v105_v41  ;;  %vm274_vm1 = vcmp.ge.f32.partialorder %v743_v47, 0.0 }
 0x134   :  { %v197_v54 = vmul.f32 0.3275911, %v193_v49  ;;  %v752_v55 = vmul.f32 0.70710677, %v746_v50  ;;  %v249_v2 = vsub.f32 0.0, %v193_v49 }
 0x135   :  { %v198_v56 = vmul.f32 0.3275911, %v194_v52  ;;  %v755_v57 = vmul.f32 0.70710677, %v749_v53  ;;  %v250_v3 = vsub.f32 0.0, %v194_v52 }
 0x136   :  { %v201_v58 = vadd.f32 1.0, %v197_v54  ;;  %v195_v59 = vand.u32 2147483647, %v752_v55  ;;  %v253_v5 = vmul.f32 %v249_v2, %v193_v49  ;;  %vm275_vm2 = vcmp.ge.f32.partialorder %v752_v55, 0.0  ;;  %v427_v55 = vld [vmem:[%s789_s4] ss:$0 sm:$0xff] }
 0x137   :  { %v202_v60 = vadd.f32 1.0, %v198_v56  ;;  %v196_v61 = vand.u32 2147483647, %v755_v57  ;;  %v254_v8 = vmul.f32 %v250_v3, %v194_v52  ;;  %vm276_vm3 = vcmp.ge.f32.partialorder %v755_v57, 0.0 }
 0x138   :  { %539 = vrcp.f32 %v201_v58  ;;  %v199_v62 = vmul.f32 0.3275911, %v195_v59  ;;  %v251_v6 = vsub.f32 0.0, %v195_v59  ;;  %v257_v14 = vmul.f32 1.442695, %v253_v5 }
 0x139   :  { %541 = vrcp.f32 %v202_v60  ;;  %v200_v63 = vmul.f32 0.3275911, %v196_v61  ;;  %v252_v9 = vsub.f32 0.0, %v196_v61  ;;  %v259_v18 = vmul.f32 1.442695, %v254_v8 }
 0x13a   :  { %v203_v1 = vadd.f32 1.0, %v199_v62  ;;  %v255_v15 = vmul.f32 %v251_v6, %v195_v59 }
 0x13b   :  { %v204_v0 = vadd.f32 1.0, %v200_v63  ;;  %v256_v19 = vmul.f32 %v252_v9, %v196_v61 }
 0x13c   :  { %543 = vrcp.f32 %v203_v1  ;;  %v261_v26 = vmul.f32 1.442695, %v255_v15 }
 0x13d   :  { %545 = vrcp.f32 %v204_v0  ;;  %v263_v29 = vmul.f32 1.442695, %v256_v19 }
 0x13e   :  { %547 = vpow2.f32 %v257_v14 }
 0x13f   :  { %549 = vpow2.f32 %v259_v18 }
 0x140   :  { %551 = vpow2.f32 %v261_v26 }
 0x141   :  { %553 = vpow2.f32 %v263_v29 }
 0x142   :  { %v540_v4 = vpop.eup %539 }
 0x143   :  { %v542_v7 = vpop.eup %541  ;;  %v213_v10 = vmul.f32 1.0614054, %v540_v4 }
 0x144   :  { %v214_v11 = vmul.f32 1.0614054, %v542_v7 }
 0x145   :  { %v217_v12 = vadd.f32 -1.4531521, %v213_v10 }
 0x146   :  { %v544_v13 = vpop.eup %543  ;;  %v218_v16 = vadd.f32 -1.4531521, %v214_v11 }
 0x147   :  { %v546_v17 = vpop.eup %545  ;;  %v221_v20 = vmul.f32 %v540_v4, %v217_v12  ;;  %v215_v21 = vmul.f32 1.0614054, %v544_v13 }
 0x148   :  { %v222_v22 = vmul.f32 %v542_v7, %v218_v16  ;;  %v216_v23 = vmul.f32 1.0614054, %v546_v17  ;;  %v548_v54 = vpop.eup %547  ;;  %v186_v16 = vmul.f32 0.5, %v737_v45  ;;  %v187_v45 = vmul.f32 0.5, %v746_v50 }
 0x149   :  { %v225_v24 = vadd.f32 1.4214138, %v221_v20  ;;  %v219_v25 = vadd.f32 -1.4531521, %v215_v21  ;;  %v550_v59 = vpop.eup %549 }
 0x14a   :  { %v226_v27 = vadd.f32 1.4214138, %v222_v22  ;;  %v220_v28 = vadd.f32 -1.4531521, %v216_v23  ;;  %v552_v2 = vpop.eup %551  ;;  %v188_v23 = vmul.f32 0.5, %v749_v53 }
 0x14b   :  { %v229_v30 = vmul.f32 %v540_v4, %v225_v24  ;;  %v223_v31 = vmul.f32 %v544_v13, %v219_v25  ;;  %v554_v6 = vpop.eup %553 }
 0x14c   :  { %v230_v32 = vmul.f32 %v542_v7, %v226_v27  ;;  %v224_v33 = vmul.f32 %v546_v17, %v220_v28 }
 0x14d   :  { %v233_v34 = vadd.f32 -0.28449672, %v229_v30  ;;  %v227_v35 = vadd.f32 1.4214138, %v223_v31 }
 0x14e   :  { %v234_v36 = vadd.f32 -0.28449672, %v230_v32  ;;  %v228_v37 = vadd.f32 1.4214138, %v224_v33 }
 0x14f   :  { %v237_v38 = vmul.f32 %v540_v4, %v233_v34  ;;  %v231_v39 = vmul.f32 %v544_v13, %v227_v35 }
 0x150   :  { %v238_v40 = vmul.f32 %v542_v7, %v234_v36  ;;  %v232_v41 = vmul.f32 %v546_v17, %v228_v37 }
 0x151   :  { %v241_v42 = vadd.f32 0.2548296, %v237_v38  ;;  %v235_v44 = vadd.f32 -0.28449672, %v231_v39 }
 0x152   :  { %v242_v48 = vadd.f32 0.2548296, %v238_v40  ;;  %v236_v49 = vadd.f32 -0.28449672, %v232_v41 }
 0x153   :  { %v245_v51 = vmul.f32 %v540_v4, %v241_v42  ;;  %v239_v52 = vmul.f32 %v544_v13, %v235_v44 }
 0x154   :  { %v246_v56 = vmul.f32 %v542_v7, %v242_v48  ;;  %v240_v58 = vmul.f32 %v546_v17, %v236_v49 }
 0x155   :  { %v265_v60 = vmul.f32 %v548_v54, %v245_v51  ;;  %v243_v61 = vadd.f32 0.2548296, %v239_v52 }
 0x156   :  { %v266_v62 = vmul.f32 %v550_v59, %v246_v56  ;;  %v244_v63 = vadd.f32 0.2548296, %v240_v58 }
 0x157   :  { %v269_v1 = vsub.f32 1.0, %v265_v60  ;;  %v247_v0 = vmul.f32 %v544_v13, %v243_v61 }
 0x158   :  { %v270_v3 = vsub.f32 1.0, %v266_v62  ;;  %v248_v5 = vmul.f32 %v546_v17, %v244_v63  ;;  %v185_v17 = vmul.f32 0.5, %v735_v43 }
 0x159   :  { %v277_v8 = vsub.f32 0.0, %v269_v1  ;;  %v267_v9 = vmul.f32 %v552_v2, %v247_v0 }
 0x15a   :  { %v278_v4 = vsub.f32 0.0, %v270_v3  ;;  %v268_v10 = vmul.f32 %v554_v6, %v248_v5 }
 0x15b   :  { %v281_v7 = vsel %vm273_vm0, %v269_v1, %v277_v8  ;;  %v271_v11 = vsub.f32 1.0, %v267_v9 }
 0x15c   :  { %v282_v12 = vsel %vm274_vm1, %v270_v3, %v278_v4  ;;  %v285_v14 = vadd.f32 1.0, %v281_v7  ;;  %v272_v15 = vsub.f32 1.0, %v268_v10 }
 0x15d   :  { %v286_v13 = vadd.f32 1.0, %v282_v12  ;;  %v279_v18 = vsub.f32 0.0, %v271_v11 }
 0x15e   :  { %v280_v19 = vsub.f32 0.0, %v272_v15  ;;  %v289_v21 = vmul.f32 %v285_v14, %v185_v17 }
 0x15f   :  { %v290_v46 = vmul.f32 %v286_v13, %v186_v16  ;;  %v283_v20 = vsel %vm275_vm2, %v271_v11, %v279_v18 }
 0x160   :  { %v284_v47 = vsel %vm276_vm3, %v272_v15, %v280_v19  ;;  %v287_v22 = vadd.f32 1.0, %v283_v20 }
 0x161   :  { %396 = vmatprep.mubr.f32.mxu1 %v290_v46  ;;  %v288_v24 = vadd.f32 1.0, %v284_v47 }
 0x162   :  { %397 = vmatmul.mubr.f32.vlgmr.msra.gmra.mrb[0].mxu1 %v289_v21  ;;  %v291_v26 = vmul.f32 %v287_v22, %v187_v45 }
 0x163   :  { %v292_v25 = vmul.f32 %v288_v24, %v188_v23 }
 0x165   :  { %401 = vmatprep.mubr.f32.mxu1 %v292_v25 }
 0x166   :  { %402 = vmatmul.mubr.f32.gmra.mrb[2].mxu1 %v291_v26 }
 0x235   :  { %v460_v43 = vpop.f32.mrb[0].mxu1 }
 0x236   :  { %v461_v57 = vpop.f32.mrb[1].mxu1 }
 0x237   :  { %v462_v27 = vadd.f32 %v461_v57, %v460_v43 }
 0x239   :  { %v399_v28 = vadd.f32 %v462_v27, %v427_v55  ;;  %v463_v29 = vpop.f32.mrb[2].mxu1 }
 0x23a   :  { %v464_v30 = vpop.f32.mrb[3].mxu1 }
 0x23b   :  { %407 = vst [vmem:[#allocation8] sm:$0xff] %v399_v28  ;;  %v465_v53 = vadd.f32 %v464_v30, %v463_v29 }
 0x23d   :  { %v404_v50 = vadd.f32 %v465_v53, %v427_v55 }
 0x23f   :  { %408 = vst [vmem:[#allocation8 + $0x8] sm:$0xff] %v404_v50 }
 0x240   :  { %632 = shalt.err (!%p629_p0)
}
 0x241   :  { %s633_s12 = scalar_lea.hbm %s790_s5, 256 }
 0x242   :  { %p634_p1 = scmp.ne.s32.totalorder %s790_s5, %s633_s12  ;;  %p637_p2 = scmp.lt.u32.totalorder %s633_s12, %s790_s5 }
 0x244   :  { %p639_p3 = pnand %p637_p2, %p634_p1 }
 0x246   :  { %642 = shalt.err (!%p639_p3)
}
 0x247   :  { %420 = dma.vmem_to_hbm [thread:$0]  %s415_s9, 256, %s790_s5, [#allocation4], %s653_s1, %s653_s1, %s654_s17  }
 0x248   :  { %647 = dma.done.wait [#allocation4], 256  }
 0x249   :  { %648 = vsyncadd [#allocation4], 4294967040 }
 0x24a   :  { %424 = vsyncpa [#allocation3], 1 }
 0x24b   :  { %425 = vsyncpa [#allocation6], 1 }
 0x24c   :  { %426 = vsyncpa [#allocation4], 1 }

// kernel: tpu_custom_call.1
= control target key start
LH: loop header
LB: loop body
LE: loop exit
PB: predicated region body
PF: predicated region fallthrough
CT: control target
= control target key end

     0   :  { %10 = vsyncpa [#allocation3], 0  ;;  %s785_s0 = inlined_call_operand.hbm [shape: f32[16,128], index: 0, kind: input, shape index: {}]   ;;  %s786_s1 = inlined_call_operand.hbm [shape: f32[128,256], index: 1, kind: input, shape index: {}]   ;;  %s787_s2 = inlined_call_operand.vmem [shape: f32[1,256], index: 2, kind: input, shape index: {}]   ;;  %s788_s3 = inlined_call_operand.hbm [shape: f32[256,128], index: 3, kind: input, shape index: {}]   ;;  %s789_s4 = inlined_call_operand.vmem [shape: f32[1,128], index: 4, kind: input, shape index: {}]   ;;  %s790_s5 = inlined_call_operand.hbm [shape: f32[16,128], index: 5, kind: output, shape index: {}]  }
   0x1   :  { %11 = vsyncpa [#allocation6], 0 }
   0x2   :  { %12 = vsyncpa [#allocation4], 0  ;;  %s649_s18 = smov [#allocation5]   ;;  %s555_s22 = scalar_lea.hbm %s786_s1, 4096 }
   0x3   :  { %s30_s19 = sshll.u32 %s649_s18, 4  ;;  %p556_p0 = scmp.ne.s32.totalorder %s786_s1, %s555_s22  ;;  %s31_s19 = int_to_ptr.vmem [resolvable:$true] %s30_s19 }
   0x4   :  { %p559_p1 = scmp.lt.u32.totalorder %s555_s22, %s786_s1 }
   0x6   :  { %p561_p2 = pnand %p559_p1, %p556_p0 }
   0x8   :  { %564 = shalt.err (!%p561_p2)
}
   0x9   :  { %s565_s27 = scalar_lea.vmem %s31_s19, 4096  ;;  %p570_p4 = scmp.lt.s32.totalorder %s31_s19, %s31_s19 }
   0xa   :  { %p566_p3 = scmp.ne.s32.totalorder %s31_s19, %s565_s27  ;;  %p571_p5 = scmp.lt.s32.totalorder %s565_s27, %s565_s27 }
   0xc   :  { %p572_p6 = por %p571_p5, %p570_p4 }
   0xe   :  { %p573_p7 = pnand %p572_p6, %p566_p3 }
  0x10   :  { %576 = shalt.err (!%p573_p7)
}
  0x11   :  { %s650_s28 = smov 256   ;;  %s651_s29 = smov 16  }
  0x12   :  { %36 = dma.hbm_to_vmem [thread:$0]  %s786_s1, 4096, %s31_s19, [#allocation6], %s650_s28, %s650_s28, %s651_s29  }
  0x13   :  { %s652_s7 = smov [#allocation2]   ;;  %s577_s11 = scalar_lea.hbm %s785_s0, 256 }
  0x14   :  { %s18_s8 = sshll.u32 %s652_s7, 4  ;;  %p578_p8 = scmp.ne.s32.totalorder %s785_s0, %s577_s11  ;;  %s19_s8 = int_to_ptr.vmem [resolvable:$true] %s18_s8 }
  0x15   :  { %p581_p9 = scmp.lt.u32.totalorder %s577_s11, %s785_s0 }
  0x17   :  { %p583_p10 = pnand %p581_p9, %p578_p8 }
  0x19   :  { %586 = shalt.err (!%p583_p10)
}
  0x1a   :  { %s587_s16 = scalar_lea.vmem %s19_s8, 256  ;;  %p592_p12 = scmp.lt.s32.totalorder %s19_s8, %s19_s8 }
  0x1b   :  { %p588_p11 = scmp.ne.s32.totalorder %s19_s8, %s587_s16  ;;  %p593_p13 = scmp.lt.s32.totalorder %s587_s16, %s587_s16 }
  0x1d   :  { %p594_p0 = por %p593_p13, %p592_p12 }
  0x1f   :  { %p595_p1 = pnand %p594_p0, %p588_p11 }
  0x21   :  { %598 = shalt.err (!%p595_p1)
}
  0x22   :  { %s653_s1 = smov 128   ;;  %s654_s17 = smov 8  }
  0x23   :  { %24 = dma.hbm_to_vmem [thread:$0]  %s785_s0, 256, %s19_s8, [#allocation3], %s653_s1, %s653_s1, %s654_s17  }
  0x24   :  { %s655_s20 = smov [#allocation7]   ;;  %s599_s24 = scalar_lea.hbm %s788_s3, 4096 }
  0x25   :  { %s44_s21 = sshll.u32 %s655_s20, 4  ;;  %p600_p2 = scmp.ne.s32.totalorder %s788_s3, %s599_s24  ;;  %s45_s21 = int_to_ptr.vmem [resolvable:$true] %s44_s21 }
  0x26   :  { %p603_p3 = scmp.lt.u32.totalorder %s599_s24, %s788_s3 }
  0x28   :  { %p605_p4 = pnand %p603_p3, %p600_p2 }
  0x2a   :  { %608 = shalt.err (!%p605_p4)
}
  0x2b   :  { %s609_s29 = scalar_lea.vmem %s45_s21, 4096  ;;  %p614_p6 = scmp.lt.s32.totalorder %s45_s21, %s45_s21 }
  0x2c   :  { %p610_p5 = scmp.ne.s32.totalorder %s45_s21, %s609_s29  ;;  %p615_p7 = scmp.lt.s32.totalorder %s609_s29, %s609_s29 }
  0x2e   :  { %p616_p8 = por %p615_p7, %p614_p6 }
  0x30   :  { %p617_p9 = pnand %p616_p8, %p610_p5 }
  0x32   :  { %620 = shalt.err (!%p617_p9)
}
  0x33   :  { %50 = dma.hbm_to_vmem [thread:$0]  %s788_s3, 4096, %s45_s21, [#allocation6], %s653_s1, %s653_s1, %s654_s17  }
  0x34   :  { %643 = dma.done.wait [#allocation3], 256  }
  0x35   :  { %644 = vsyncadd [#allocation3], 4294967040 }
  0x36   :  { %645 = dma.done.wait [#allocation6], 8192  }
  0x37   :  { %646 = vsyncadd [#allocation6], 4294959104  ;;  %v656_v0 = vmov 0.0   ;;  %v65_v1 = vld [vmem:[#allocation5 + $0x8] sm:$0xff]  ;;  %v67_v2 = vld [vmem:[#allocation5 + $0x18] sm:$0xff]  ;;  %s657_s8 = smov [#allocation8]  }
  0x38   :  { %172 = vmatprep.mubr.f32.mxu0 %v656_v0  ;;  %v64_v3 = vld [vmem:[#allocation5] sm:$0xff]  ;;  %v466_v4 = vpack.c.bf16 %v67_v2, %v65_v1  ;;  %v66_v5 = vld [vmem:[#allocation5 + $0x10] sm:$0xff]  ;;  %v69_v6 = vld [vmem:[#allocation5 + $0x28] sm:$0xff]  ;;  %s414_s9 = sshll.u32 %s657_s8, 4  ;;  %s415_s9 = int_to_ptr.vmem [resolvable:$true] %s414_s9 }
  0x39   :  { %v71_v7 = vld [vmem:[#allocation5 + $0x38] sm:$0xff]  ;;  %v468_v8 = vpack.c.bf16 %v66_v5, %v64_v3  ;;  %v68_v10 = vld [vmem:[#allocation5 + $0x20] sm:$0xff]  ;;  %v70_v11 = vld [vmem:[#allocation5 + $0x30] sm:$0xff]  ;;  %s621_s10 = scalar_lea.vmem %s415_s9, 256  ;;  %p626_p11 = scmp.lt.s32.totalorder %s415_s9, %s415_s9 }
  0x3a   :  { %v470_v9 = vpack.c.bf16 %v71_v7, %v69_v6  ;;  %v73_v12 = vld [vmem:[#allocation5 + $0x48] sm:$0xff]  ;;  %467 = vmatprep.subr.bf16.mxu0 %v466_v4  ;;  %v75_v13 = vld [vmem:[#allocation5 + $0x58] sm:$0xff]  ;;  %v472_v14 = vpack.c.bf16 %v70_v11, %v68_v10  ;;  %v72_v16 = vld [vmem:[#allocation5 + $0x40] sm:$0xff]  ;;  %p622_p10 = scmp.ne.s32.totalorder %s415_s9, %s621_s10  ;;  %p627_p12 = scmp.lt.s32.totalorder %s621_s10, %s621_s10 }
  0x3b   :  { %469 = vmatpush1.bf16.msra.mxu0 %v468_v8  ;;  %v474_v15 = vpack.c.bf16 %v75_v13, %v73_v12  ;;  %v74_v17 = vld [vmem:[#allocation5 + $0x50] sm:$0xff]  ;;  %v77_v18 = vld [vmem:[#allocation5 + $0x68] sm:$0xff]  ;;  %v79_v19 = vld [vmem:[#allocation5 + $0x78] sm:$0xff] }
  0x3c   :  { %471 = vmatprep.subr.bf16.mxu0 %v470_v9  ;;  %v476_v20 = vpack.c.bf16 %v74_v17, %v72_v16  ;;  %v478_v21 = vpack.c.bf16 %v79_v19, %v77_v18  ;;  %v76_v22 = vld [vmem:[#allocation5 + $0x60] sm:$0xff]  ;;  %v78_v23 = vld [vmem:[#allocation5 + $0x70] sm:$0xff]  ;;  %v81_v24 = vld [vmem:[#allocation5 + $0x88] sm:$0xff]  ;;  %p628_p13 = por %p627_p12, %p626_p11 }
  0x3d   :  { %v83_v25 = vld [vmem:[#allocation5 + $0x98] sm:$0xff]  ;;  %v480_v26 = vpack.c.bf16 %v78_v23, %v76_v22  ;;  %v80_v28 = vld [vmem:[#allocation5 + $0x80] sm:$0xff]  ;;  %v82_v29 = vld [vmem:[#allocation5 + $0x90] sm:$0xff] }
  0x3e   :  { %v482_v27 = vpack.c.bf16 %v83_v25, %v81_v24  ;;  %v85_v30 = vld [vmem:[#allocation5 + $0xa8] sm:$0xff]  ;;  %v87_v31 = vld [vmem:[#allocation5 + $0xb8] sm:$0xff]  ;;  %v484_v32 = vpack.c.bf16 %v82_v29, %v80_v28  ;;  %v84_v34 = vld [vmem:[#allocation5 + $0xa0] sm:$0xff]  ;;  %p629_p0 = pnand %p628_p13, %p622_p10 }
  0x3f   :  { %473 = vmatpush1.bf16.msra.mxu0 %v472_v14  ;;  %v486_v33 = vpack.c.bf16 %v87_v31, %v85_v30  ;;  %v86_v35 = vld [vmem:[#allocation5 + $0xb0] sm:$0xff]  ;;  %v89_v36 = vld [vmem:[#allocation5 + $0xc8] sm:$0xff]  ;;  %v91_v37 = vld [vmem:[#allocation5 + $0xd8] sm:$0xff] }
  0x40   :  { %475 = vmatprep.subr.bf16.mxu0 %v474_v15  ;;  %v488_v38 = vpack.c.bf16 %v86_v35, %v84_v34  ;;  %v490_v39 = vpack.c.bf16 %v91_v37, %v89_v36  ;;  %v88_v40 = vld [vmem:[#allocation5 + $0xc0] sm:$0xff]  ;;  %v90_v41 = vld [vmem:[#allocation5 + $0xd0] sm:$0xff]  ;;  %v93_v42 = vld [vmem:[#allocation5 + $0xe8] sm:$0xff]  ;;  %v98_v35 = vlaneseq }
  0x41   :  { %v95_v43 = vld [vmem:[#allocation5 + $0xf8] sm:$0xff]  ;;  %v492_v44 = vpack.c.bf16 %v90_v41, %v88_v40  ;;  %v92_v46 = vld [vmem:[#allocation5 + $0xe0] sm:$0xff]  ;;  %v94_v47 = vld [vmem:[#allocation5 + $0xf0] sm:$0xff] }
  0x42   :  { %v494_v45 = vpack.c.bf16 %v95_v43, %v93_v42  ;;  %v496_v48 = vpack.c.bf16 %v94_v47, %v92_v46  ;;  %v62_v49 = vld [vmem:[#allocation2] sm:$0xff]  ;;  %v63_v50 = vld [vmem:[#allocation2 + $0x8] sm:$0xff]  ;;  %v309_v51 = vld [vmem:[#allocation7 + $0x80] sm:$0xff]  ;;  %v99_v36 = vshrl.u32 %v98_v35, 7 }
  0x43   :  { %477 = vmatpush1.bf16.msra.mxu0 %v476_v20  ;;  %v310_v52 = vld [vmem:[#allocation7 + $0x88] sm:$0xff]  ;;  %v293_v53 = vld [vmem:[#allocation7] sm:$0xff]  ;;  %v311_v56 = vld [vmem:[#allocation7 + $0x90] sm:$0xff] }
  0x44   :  { %479 = vmatprep.subr.bf16.mxu0 %v478_v21  ;;  %v498_v54 = vpack.c.bf16 %v310_v52, %v309_v51  ;;  %v294_v55 = vld [vmem:[#allocation7 + $0x8] sm:$0xff]  ;;  %v312_v57 = vld [vmem:[#allocation7 + $0x98] sm:$0xff]  ;;  %v295_v60 = vld [vmem:[#allocation7 + $0x10] sm:$0xff]  ;;  %v100_v37 = vsub.s32 0, %v99_v36 }
  0x45   :  { %v500_v58 = vpack.c.bf16 %v294_v55, %v293_v53  ;;  %v502_v59 = vpack.c.bf16 %v312_v57, %v311_v56  ;;  %v296_v61 = vld [vmem:[#allocation7 + $0x18] sm:$0xff]  ;;  %v313_v62 = vld [vmem:[#allocation7 + $0xa0] sm:$0xff]  ;;  %v314_v63 = vld [vmem:[#allocation7 + $0xa8] sm:$0xff] }
  0x46   :  { %499 = vmatprep.subr.bf16.mxu1 %v498_v54  ;;  %v504_v1 = vpack.c.bf16 %v296_v61, %v295_v60  ;;  %v297_v2 = vld [vmem:[#allocation7 + $0x20] sm:$0xff]  ;;  %v298_v3 = vld [vmem:[#allocation7 + $0x28] sm:$0xff]  ;;  %v315_v4 = vld [vmem:[#allocation7 + $0xb0] sm:$0xff] }
  0x47   :  { %481 = vmatpush1.bf16.msra.mxu0 %v480_v26  ;;  %501 = vmatpush3.bf16.msra.mxu1 %v500_v58  ;;  %v316_v5 = vld [vmem:[#allocation7 + $0xb8] sm:$0xff]  ;;  %v508_v6 = vpack.c.bf16 %v298_v3, %v297_v2  ;;  %v299_v8 = vld [vmem:[#allocation7 + $0x30] sm:$0xff]  ;;  %v317_v10 = vld [vmem:[#allocation7 + $0xc0] sm:$0xff] }
  0x48   :  { %483 = vmatprep.subr.bf16.mxu0 %v482_v27  ;;  %503 = vmatprep.subr.bf16.mxu1 %v502_v59  ;;  %v510_v7 = vpack.c.bf16 %v316_v5, %v315_v4  ;;  %v300_v9 = vld [vmem:[#allocation7 + $0x38] sm:$0xff]  ;;  %v318_v11 = vld [vmem:[#allocation7 + $0xc8] sm:$0xff]  ;;  %v301_v14 = vld [vmem:[#allocation7 + $0x40] sm:$0xff] }
  0x49   :  { %v512_v12 = vpack.c.bf16 %v300_v9, %v299_v8  ;;  %v514_v13 = vpack.c.bf16 %v318_v11, %v317_v10  ;;  %v302_v15 = vld [vmem:[#allocation7 + $0x48] sm:$0xff]  ;;  %v319_v16 = vld [vmem:[#allocation7 + $0xd0] sm:$0xff]  ;;  %v320_v17 = vld [vmem:[#allocation7 + $0xd8] sm:$0xff] }
  0x4a   :  { %v516_v18 = vpack.c.bf16 %v302_v15, %v301_v14  ;;  %v518_v19 = vpack.c.bf16 %v320_v17, %v319_v16  ;;  %v303_v20 = vld [vmem:[#allocation7 + $0x50] sm:$0xff]  ;;  %v304_v21 = vld [vmem:[#allocation7 + $0x58] sm:$0xff]  ;;  %v321_v22 = vld [vmem:[#allocation7 + $0xe0] sm:$0xff] }
  0x4b   :  { %485 = vmatpush1.bf16.msra.mxu0 %v484_v32  ;;  %505 = vmatpush3.bf16.msra.mxu1 %v504_v1  ;;  %v322_v23 = vld [vmem:[#allocation7 + $0xe8] sm:$0xff]  ;;  %v520_v24 = vpack.c.bf16 %v304_v21, %v303_v20  ;;  %v305_v26 = vld [vmem:[#allocation7 + $0x60] sm:$0xff]  ;;  %v323_v28 = vld [vmem:[#allocation7 + $0xf0] sm:$0xff] }
  0x4c   :  { %487 = vmatprep.subr.bf16.mxu0 %v486_v33  ;;  %v522_v25 = vpack.c.bf16 %v322_v23, %v321_v22  ;;  %v306_v27 = vld [vmem:[#allocation7 + $0x68] sm:$0xff]  ;;  %v324_v29 = vld [vmem:[#allocation7 + $0xf8] sm:$0xff]  ;;  %v307_v32 = vld [vmem:[#allocation7 + $0x70] sm:$0xff] }
  0x4d   :  { %v524_v30 = vpack.c.bf16 %v306_v27, %v305_v26  ;;  %v526_v31 = vpack.c.bf16 %v324_v29, %v323_v28  ;;  %v308_v33 = vld [vmem:[#allocation7 + $0x78] sm:$0xff] }
  0x4e   :  { %v528_v34 = vpack.c.bf16 %v308_v33, %v307_v32 }
  0x4f   :  { %489 = vmatpush1.bf16.msra.mxu0 %v488_v38  ;;  %v96_v38 = vld [vmem:[%s787_s2] sm:$0x3] }
  0x50   :  { %491 = vmatprep.subr.bf16.mxu0 %v490_v39  ;;  %v104_v39 = vsub.s32 1, %v99_v36  ;;  %v101_v40 = vrot.slane %v96_v38, %v100_v37 }
  0x52   :  { %v105_v41 = vrot.slane %v96_v38, %v104_v39 }
  0x53   :  { %493 = vmatpush1.bf16.msra.mxu0 %v492_v44 }
  0x54   :  { %495 = vmatprep.subr.bf16.mxu0 %v494_v45 }
  0x57   :  { %497 = vmatpush1.bf16.msra.mxu0 %v496_v48 }
  0x5a   :  { %173 = vmatmul.mubr.f32.vlgmr.msra.gmra.mrb[0].mxu0 %v62_v49 }
  0x5b   :  { %178 = vmatprep.mubr.f32.mxu0 %v656_v0  ;;  %v506_v0 = vpack.c.bf16 %v314_v63, %v313_v62 }
  0x5d   :  { %507 = vmatprep.subr.bf16.mxu1 %v506_v0 }
  0x5e   :  { %179 = vmatmul.mubr.f32.gmra.mrb[2].mxu0 %v63_v50  ;;  %509 = vmatpush3.bf16.msra.mxu1 %v508_v6 }
  0x5f   :  { %511 = vmatprep.subr.bf16.mxu1 %v510_v7 }
  0x62   :  { %513 = vmatpush3.bf16.msra.mxu1 %v512_v12 }
  0x63   :  { %515 = vmatprep.subr.bf16.mxu1 %v514_v13 }
  0x66   :  { %517 = vmatpush3.bf16.msra.mxu1 %v516_v18 }
  0x67   :  { %519 = vmatprep.subr.bf16.mxu1 %v518_v19 }
  0x6a   :  { %521 = vmatpush3.bf16.msra.mxu1 %v520_v24 }
  0x6b   :  { %523 = vmatprep.subr.bf16.mxu1 %v522_v25 }
  0x6e   :  { %525 = vmatpush3.bf16.msra.mxu1 %v524_v30 }
  0x6f   :  { %527 = vmatprep.subr.bf16.mxu1 %v526_v31 }
  0x72   :  { %529 = vmatpush3.bf16.msra.mxu1 %v528_v34 }
 0x12d   :  { %v174_v42 = vpop.f32.mrb[0].mxu0 }
 0x12e   :  { %v735_v43 = vadd.f32 %v174_v42, %v101_v40  ;;  %v176_v44 = vpop.f32.mrb[1].mxu0 }
 0x12f   :  { %v737_v45 = vadd.f32 %v176_v44, %v105_v41 }
 0x130   :  { %v740_v46 = vmul.f32 0.70710677, %v735_v43 }
 0x131   :  { %v743_v47 = vmul.f32 0.70710677, %v737_v45  ;;  %v180_v48 = vpop.f32.mrb[2].mxu0 }
 0x132   :  { %v193_v49 = vand.u32 2147483647, %v740_v46  ;;  %v746_v50 = vadd.f32 %v180_v48, %v101_v40  ;;  %v182_v51 = vpop.f32.mrb[3].mxu0  ;;  %vm273_vm0 = vcmp.ge.f32.partialorder %v740_v46, 0.0 }
 0x133   :  { %v194_v52 = vand.u32 2147483647, %v743_v47  ;;  %v749_v53 = vadd.f32 %v182_v51, %v105_v41  ;;  %vm274_vm1 = vcmp.ge.f32.partialorder %v743_v47, 0.0 }
 0x134   :  { %v197_v54 = vmul.f32 0.3275911, %v193_v49  ;;  %v752_v55 = vmul.f32 0.70710677, %v746_v50  ;;  %v249_v2 = vsub.f32 0.0, %v193_v49 }
 0x135   :  { %v198_v56 = vmul.f32 0.3275911, %v194_v52  ;;  %v755_v57 = vmul.f32 0.70710677, %v749_v53  ;;  %v250_v3 = vsub.f32 0.0, %v194_v52 }
 0x136   :  { %v201_v58 = vadd.f32 1.0, %v197_v54  ;;  %v195_v59 = vand.u32 2147483647, %v752_v55  ;;  %v253_v5 = vmul.f32 %v249_v2, %v193_v49  ;;  %vm275_vm2 = vcmp.ge.f32.partialorder %v752_v55, 0.0  ;;  %v427_v55 = vld [vmem:[%s789_s4] ss:$0 sm:$0xff] }
 0x137   :  { %v202_v60 = vadd.f32 1.0, %v198_v56  ;;  %v196_v61 = vand.u32 2147483647, %v755_v57  ;;  %v254_v8 = vmul.f32 %v250_v3, %v194_v52  ;;  %vm276_vm3 = vcmp.ge.f32.partialorder %v755_v57, 0.0 }
 0x138   :  { %539 = vrcp.f32 %v201_v58  ;;  %v199_v62 = vmul.f32 0.3275911, %v195_v59  ;;  %v251_v6 = vsub.f32 0.0, %v195_v59  ;;  %v257_v14 = vmul.f32 1.442695, %v253_v5 }
 0x139   :  { %541 = vrcp.f32 %v202_v60  ;;  %v200_v63 = vmul.f32 0.3275911, %v196_v61  ;;  %v252_v9 = vsub.f32 0.0, %v196_v61  ;;  %v259_v18 = vmul.f32 1.442695, %v254_v8 }
 0x13a   :  { %v203_v1 = vadd.f32 1.0, %v199_v62  ;;  %v255_v15 = vmul.f32 %v251_v6, %v195_v59 }
 0x13b   :  { %v204_v0 = vadd.f32 1.0, %v200_v63  ;;  %v256_v19 = vmul.f32 %v252_v9, %v196_v61 }
 0x13c   :  { %543 = vrcp.f32 %v203_v1  ;;  %v261_v26 = vmul.f32 1.442695, %v255_v15 }
 0x13d   :  { %545 = vrcp.f32 %v204_v0  ;;  %v263_v29 = vmul.f32 1.442695, %v256_v19 }
 0x13e   :  { %547 = vpow2.f32 %v257_v14 }
 0x13f   :  { %549 = vpow2.f32 %v259_v18 }
 0x140   :  { %551 = vpow2.f32 %v261_v26 }
 0x141   :  { %553 = vpow2.f32 %v263_v29 }
 0x142   :  { %v540_v4 = vpop.eup %539 }
 0x143   :  { %v542_v7 = vpop.eup %541  ;;  %v213_v10 = vmul.f32 1.0614054, %v540_v4 }
 0x144   :  { %v214_v11 = vmul.f32 1.0614054, %v542_v7 }
 0x145   :  { %v217_v12 = vadd.f32 -1.4531521, %v213_v10 }
 0x146   :  { %v544_v13 = vpop.eup %543  ;;  %v218_v16 = vadd.f32 -1.4531521, %v214_v11 }
 0x147   :  { %v546_v17 = vpop.eup %545  ;;  %v221_v20 = vmul.f32 %v540_v4, %v217_v12  ;;  %v215_v21 = vmul.f32 1.0614054, %v544_v13 }
 0x148   :  { %v222_v22 = vmul.f32 %v542_v7, %v218_v16  ;;  %v216_v23 = vmul.f32 1.0614054, %v546_v17  ;;  %v548_v54 = vpop.eup %547  ;;  %v186_v16 = vmul.f32 0.5, %v737_v45  ;;  %v187_v45 = vmul.f32 0.5, %v746_v50 }
 0x149   :  { %v225_v24 = vadd.f32 1.4214138, %v221_v20  ;;  %v219_v25 = vadd.f32 -1.4531521, %v215_v21  ;;  %v550_v59 = vpop.eup %549 }
 0x14a   :  { %v226_v27 = vadd.f32 1.4214138, %v222_v22  ;;  %v220_v28 = vadd.f32 -1.4531521, %v216_v23  ;;  %v552_v2 = vpop.eup %551  ;;  %v188_v23 = vmul.f32 0.5, %v749_v53 }
 0x14b   :  { %v229_v30 = vmul.f32 %v540_v4, %v225_v24  ;;  %v223_v31 = vmul.f32 %v544_v13, %v219_v25  ;;  %v554_v6 = vpop.eup %553 }
 0x14c   :  { %v230_v32 = vmul.f32 %v542_v7, %v226_v27  ;;  %v224_v33 = vmul.f32 %v546_v17, %v220_v28 }
 0x14d   :  { %v233_v34 = vadd.f32 -0.28449672, %v229_v30  ;;  %v227_v35 = vadd.f32 1.4214138, %v223_v31 }
 0x14e   :  { %v234_v36 = vadd.f32 -0.28449672, %v230_v32  ;;  %v228_v37 = vadd.f32 1.4214138, %v224_v33 }
 0x14f   :  { %v237_v38 = vmul.f32 %v540_v4, %v233_v34  ;;  %v231_v39 = vmul.f32 %v544_v13, %v227_v35 }
 0x150   :  { %v238_v40 = vmul.f32 %v542_v7, %v234_v36  ;;  %v232_v41 = vmul.f32 %v546_v17, %v228_v37 }
 0x151   :  { %v241_v42 = vadd.f32 0.2548296, %v237_v38  ;;  %v235_v44 = vadd.f32 -0.28449672, %v231_v39 }
 0x152   :  { %v242_v48 = vadd.f32 0.2548296, %v238_v40  ;;  %v236_v49 = vadd.f32 -0.28449672, %v232_v41 }
 0x153   :  { %v245_v51 = vmul.f32 %v540_v4, %v241_v42  ;;  %v239_v52 = vmul.f32 %v544_v13, %v235_v44 }
 0x154   :  { %v246_v56 = vmul.f32 %v542_v7, %v242_v48  ;;  %v240_v58 = vmul.f32 %v546_v17, %v236_v49 }
 0x155   :  { %v265_v60 = vmul.f32 %v548_v54, %v245_v51  ;;  %v243_v61 = vadd.f32 0.2548296, %v239_v52 }
 0x156   :  { %v266_v62 = vmul.f32 %v550_v59, %v246_v56  ;;  %v244_v63 = vadd.f32 0.2548296, %v240_v58 }
 0x157   :  { %v269_v1 = vsub.f32 1.0, %v265_v60  ;;  %v247_v0 = vmul.f32 %v544_v13, %v243_v61 }
 0x158   :  { %v270_v3 = vsub.f32 1.0, %v266_v62  ;;  %v248_v5 = vmul.f32 %v546_v17, %v244_v63  ;;  %v185_v17 = vmul.f32 0.5, %v735_v43 }
 0x159   :  { %v277_v8 = vsub.f32 0.0, %v269_v1  ;;  %v267_v9 = vmul.f32 %v552_v2, %v247_v0 }
 0x15a   :  { %v278_v4 = vsub.f32 0.0, %v270_v3  ;;  %v268_v10 = vmul.f32 %v554_v6, %v248_v5 }
 0x15b   :  { %v281_v7 = vsel %vm273_vm0, %v269_v1, %v277_v8  ;;  %v271_v11 = vsub.f32 1.0, %v267_v9 }
 0x15c   :  { %v282_v12 = vsel %vm274_vm1, %v270_v3, %v278_v4  ;;  %v285_v14 = vadd.f32 1.0, %v281_v7  ;;  %v272_v15 = vsub.f32 1.0, %v268_v10 }
 0x15d   :  { %v286_v13 = vadd.f32 1.0, %v282_v12  ;;  %v279_v18 = vsub.f32 0.0, %v271_v11 }
 0x15e   :  { %v280_v19 = vsub.f32 0.0, %v272_v15  ;;  %v289_v21 = vmul.f32 %v285_v14, %v185_v17 }
 0x15f   :  { %v290_v46 = vmul.f32 %v286_v13, %v186_v16  ;;  %v283_v20 = vsel %vm275_vm2, %v271_v11, %v279_v18 }
 0x160   :  { %v284_v47 = vsel %vm276_vm3, %v272_v15, %v280_v19  ;;  %v287_v22 = vadd.f32 1.0, %v283_v20 }
 0x161   :  { %396 = vmatprep.mubr.f32.mxu1 %v290_v46  ;;  %v288_v24 = vadd.f32 1.0, %v284_v47 }
 0x162   :  { %397 = vmatmul.mubr.f32.vlgmr.msra.gmra.mrb[0].mxu1 %v289_v21  ;;  %v291_v26 = vmul.f32 %v287_v22, %v187_v45 }
 0x163   :  { %v292_v25 = vmul.f32 %v288_v24, %v188_v23 }
 0x165   :  { %401 = vmatprep.mubr.f32.mxu1 %v292_v25 }
 0x166   :  { %402 = vmatmul.mubr.f32.gmra.mrb[2].mxu1 %v291_v26 }
 0x235   :  { %v460_v43 = vpop.f32.mrb[0].mxu1 }
 0x236   :  { %v461_v57 = vpop.f32.mrb[1].mxu1 }
 0x237   :  { %v462_v27 = vadd.f32 %v461_v57, %v460_v43 }
 0x239   :  { %v399_v28 = vadd.f32 %v462_v27, %v427_v55  ;;  %v463_v29 = vpop.f32.mrb[2].mxu1 }
 0x23a   :  { %v464_v30 = vpop.f32.mrb[3].mxu1 }
 0x23b   :  { %407 = vst [vmem:[#allocation8] sm:$0xff] %v399_v28  ;;  %v465_v53 = vadd.f32 %v464_v30, %v463_v29 }
 0x23d   :  { %v404_v50 = vadd.f32 %v465_v53, %v427_v55 }
 0x23f   :  { %408 = vst [vmem:[#allocation8 + $0x8] sm:$0xff] %v404_v50 }
 0x240   :  { %632 = shalt.err (!%p629_p0)
}
 0x241   :  { %s633_s12 = scalar_lea.hbm %s790_s5, 256 }
 0x242   :  { %p634_p1 = scmp.ne.s32.totalorder %s790_s5, %s633_s12  ;;  %p637_p2 = scmp.lt.u32.totalorder %s633_s12, %s790_s5 }
 0x244   :  { %p639_p3 = pnand %p637_p2, %p634_p1 }
 0x246   :  { %642 = shalt.err (!%p639_p3)
}
 0x247   :  { %420 = dma.vmem_to_hbm [thread:$0]  %s415_s9, 256, %s790_s5, [#allocation4], %s653_s1, %s653_s1, %s654_s17  }
 0x248   :  { %647 = dma.done.wait [#allocation4], 256  }
 0x249   :  { %648 = vsyncadd [#allocation4], 4294967040 }
 0x24a   :  { %424 = vsyncpa [#allocation3], 1 }
 0x24b   :  { %425 = vsyncpa [#allocation6], 1 }
 0x24c   :  { %426 = vsyncpa [#allocation4], 1 }

</bundles_post_ra>
